<compile_context>
chip_gen: v7x
topology: tpu7x:2x2x1
jax: 0.10.0
libtpu: 0.0.40
codegen_flags: <defaults>
</compile_context>

<pallas_src>
import numpy as np
import jax
import jax.numpy as jnp
from jax.experimental import pallas as pl
from jax.experimental.pallas import tpu as pltpu


def gd_adversary_kernel(x_ref, mask_ref, attack_ref, out_ref):
    # x_ref:      (T, D)  x.dtype
    # mask_ref:   (T, 1)  float32 {0, 1}
    # attack_ref: (T, D)  x.dtype (already cast, matching `.to(x.dtype)`)
    # out_ref:    (T, D)  x.dtype
    x = x_ref[...]
    on = mask_ref[...] != 0.0                      # (T, 1), broadcasts over lanes
    out_ref[...] = jnp.where(on, x + attack_ref[...], x)


def _choose_row_tile(N, D, itemsize, target_bytes=2 * 1024 * 1024):
    """Largest multiple-of-8 divisor of N giving roughly <= target_bytes per (T, D) tile."""
    if N % 8 != 0:
        return N                                   # full-extent block is always legal
    target_rows = max(8, min(N, target_bytes // max(1, D * itemsize)))
    t = (target_rows // 8) * 8
    while t >= 8:
        if N % t == 0:
            return t
        t -= 8
    return N


def gd_adversary_forward(x, attack, attack_mask):
    """x: [B, S, D]; attack: [B, S_attack, D]; attack_mask: bool [B, S_attack]."""
    B, S, D = x.shape

    # PyTorch early-exit: single-token input with a longer attack passes through.
    if S == 1 and attack.shape[1] != 1:
        return x

    if attack.shape[1] < S:
        raise ValueError(
            f"Attack shape {attack.shape} is shorter than input shape {x.shape}")

    # Static slicing to the current sequence length (matches [:, :x.shape[1]]).
    attack_s = attack[:, :S, :].astype(x.dtype)                         # `.to(x.dtype)`
    mask_f = jnp.asarray(attack_mask)[:, :S].astype(jnp.float32)

    # Flatten (B, S) -> rows: lane-dense 2-D tiles, single parallel grid axis.
    N = B * S
    x2 = x.reshape(N, D)
    a2 = attack_s.reshape(N, D)
    m2 = mask_f.reshape(N, 1)

    T = _choose_row_tile(N, D, jnp.dtype(x.dtype).itemsize)
    grid = (N // T,)

    grid_spec = pltpu.PrefetchScalarGridSpec(
        num_scalar_prefetch=0,
        grid=grid,
        in_specs=[
            pl.BlockSpec((T, D), lambda i: (i, 0)),   # x
            pl.BlockSpec((T, 1), lambda i: (i, 0)),   # mask (skinny column)
            pl.BlockSpec((T, D), lambda i: (i, 0)),   # attack
        ],
        out_specs=pl.BlockSpec((T, D), lambda i: (i, 0)),
    )

    out2 = pl.pallas_call(
        gd_adversary_kernel,
        out_shape=jax.ShapeDtypeStruct((N, D), x.dtype),
        grid_spec=grid_spec,
        compiler_params=pltpu.CompilerParams(
            dimension_semantics=("parallel",)),
    )(x2, m2, a2)

    return out2.reshape(B, S, D)


def init_attack(key, mask_shape, dim, epsilon):
    """kaiming_uniform_ + clip_attack equivalent (plain JAX glue, not the kernel)."""
    B, S_attack = mask_shape
    fan_in = S_attack * dim                        # torch fan_in for a (B, S, D) tensor
    bound = np.sqrt(2.0) * np.sqrt(3.0 / fan_in)   # gain(a=0) = sqrt(2)
    attack = jax.random.uniform(key, (B, S_attack, dim), jnp.float32,
                                minval=-bound, maxval=bound)
    # clip_attack: per-row L2 norm clipped to epsilon.
    norms = jnp.linalg.norm(attack, axis=-1, keepdims=True)
    scale = jnp.maximum(norms / epsilon, 1.0)
    return attack / scale


if __name__ == "__main__":
    B, S, D = 2, 8, 128         # batch, seq, hidden dim (lane-dense D)
    S_attack = 12               # attack buffer is longer than the input sequence
    epsilon = 0.5

    key = jax.random.PRNGKey(0)
    k_attack, k_x = jax.random.split(key)

    # attack_mask: arbitrary boolean pattern over the (longer) attack buffer.
    attack_mask_np = np.zeros((B, S_attack), dtype=bool)
    attack_mask_np[0, :4] = True            # row 0: first 4 positions
    attack_mask_np[1, ::3] = True           # row 1: every 3rd position
    attack_mask_np[:, S:] = True            # positions beyond S must be ignored

    attack = init_attack(k_attack, (B, S_attack), D, epsilon)   # (B, S_attack, D)
    x = jax.random.normal(k_x, (B, S, D), jnp.float32)          # (B, S, D)

    out = gd_adversary_forward(x, attack, jnp.asarray(attack_mask_np))
    out = jax.block_until_ready(out)

    # Pure-numpy reference of the PyTorch forward for verification.
    x_np = np.asarray(x)
    attack_np = np.asarray(attack)
    ref = x_np.copy()
    m = attack_mask_np[:, :S]
    ref[m] = ref[m] + attack_np[:, :S][m]

    np.testing.assert_allclose(np.asarray(out), ref, rtol=1e-5, atol=1e-5)
    print("KERNEL_OK")
</pallas_src>

<mosaic_0001>
module attributes {stable_mosaic.version = 11 : i64} {
  func.func @gd_adversary_kernel(%arg0: i32, %arg1: memref<16x128xf32, #tpu.memory_space<vmem>>, %arg2: memref<16x1xf32, #tpu.memory_space<vmem>>, %arg3: memref<16x128xf32, #tpu.memory_space<vmem>>, %arg4: memref<16x128xf32, #tpu.memory_space<vmem>>) attributes {dimension_semantics = [#tpu.dimension_semantics<parallel>], iteration_bounds = array<i64: 1>, scalar_prefetch = 0 : i64, scratch_operands = 0 : i64, tpu.core_type = #tpu.core_type<tc>, window_params = [{transform_indices = @transform_0, window_bounds = array<i64: 16, 128>}, {transform_indices = @transform_1, window_bounds = array<i64: 16, 1>}, {transform_indices = @transform_2, window_bounds = array<i64: 16, 128>}, {transform_indices = @transform_3, window_bounds = array<i64: 16, 128>}]} {
    %c0 = arith.constant 0 : index
    %c0_0 = arith.constant 0 : index
    %0 = vector.load %arg1[%c0, %c0_0] : memref<16x128xf32, #tpu.memory_space<vmem>>, vector<16x128xf32>
    %c0_1 = arith.constant 0 : index
    %c0_2 = arith.constant 0 : index
    %1 = vector.load %arg2[%c0_1, %c0_2] : memref<16x1xf32, #tpu.memory_space<vmem>>, vector<16x1xf32>
    %cst = arith.constant 0.000000e+00 : f32
    %2 = vector.broadcast %cst : f32 to vector<16x1xf32>
    %3 = arith.cmpf one, %1, %2 : vector<16x1xf32>
    %c0_3 = arith.constant 0 : index
    %c0_4 = arith.constant 0 : index
    %4 = vector.load %arg3[%c0_3, %c0_4] : memref<16x128xf32, #tpu.memory_space<vmem>>, vector<16x128xf32>
    %5 = arith.addf %0, %4 : vector<16x128xf32>
    %6 = vector.shape_cast %3 : vector<16x1xi1> to vector<16x1xi1>
    %7 = vector.broadcast %6 : vector<16x1xi1> to vector<16x128xi1>
    %8 = arith.select %7, %5, %0 : vector<16x128xi1>, vector<16x128xf32>
    %c0_5 = arith.constant 0 : index
    %c0_6 = arith.constant 0 : index
    %9 = vector.load %arg4[%c0_5, %c0_6] : memref<16x128xf32, #tpu.memory_space<vmem>>, vector<16x128xf32>
    tpu.vector_store %arg4[%c0_5, %c0_6], %8 {strides = array<i32>} : memref<16x128xf32, #tpu.memory_space<vmem>>, vector<16x128xf32>,
    return
  }
  func.func @transform_0(%arg0: i32) -> (i32, i32) {
    %c0_i32 = arith.constant 0 : i32
    %c0_i32_0 = arith.constant 0 : i32
    return %arg0, %c0_i32 : i32, i32
  }
  func.func @transform_1(%arg0: i32) -> (i32, i32) {
    %c0_i32 = arith.constant 0 : i32
    %c0_i32_0 = arith.constant 0 : i32
    return %arg0, %c0_i32 : i32, i32
  }
  func.func @transform_2(%arg0: i32) -> (i32, i32) {
    %c0_i32 = arith.constant 0 : i32
    %c0_i32_0 = arith.constant 0 : i32
    return %arg0, %c0_i32 : i32, i32
  }
  func.func @transform_3(%arg0: i32) -> (i32, i32) {
    %c0_i32 = arith.constant 0 : i32
    %c0_i32_0 = arith.constant 0 : i32
    return %arg0, %c0_i32 : i32, i32
  }
}

</mosaic_0001>

<bundles_post_ra>
// kernel: tpu_custom_call.1
= control target key start
LH: loop header
LB: loop body
LE: loop exit
PB: predicated region body
PF: predicated region fallthrough
CT: control target
= control target key end

     0   :  { %8 = vsyncpa [#allocation3], 0  ;;  %s191_s0 = inlined_call_operand.vmem [shape: f32[16,128], index: 0, kind: input, shape index: {}]   ;;  %s192_s1 = inlined_call_operand.vmem [shape: f32[16,1], index: 1, kind: input, shape index: {}]   ;;  %s193_s2 = inlined_call_operand.hbm [shape: f32[16,128], index: 2, kind: input, shape index: {}]   ;;  %s194_s3 = inlined_call_operand.hbm [shape: f32[16,128], index: 3, kind: output, shape index: {}]  }
   0x1   :  { %9 = vsyncpa [#allocation4], 0  ;;  %s124_s12 = smov [#allocation2]   ;;  %s76_s16 = scalar_lea.hbm %s193_s2, 256 }
   0x2   :  { %s19_s13 = sshll.u32 %s124_s12, 4  ;;  %p77_p0 = scmp.ne.s32.totalorder %s193_s2, %s76_s16  ;;  %s20_s13 = int_to_ptr.vmem [resolvable:$true] %s19_s13 }
   0x3   :  { %p80_p1 = scmp.lt.u32.totalorder %s76_s16, %s193_s2 }
   0x5   :  { %p82_p2 = pnand %p80_p1, %p77_p0 }
   0x7   :  { %85 = shalt.err (!%p82_p2)
}
   0x8   :  { %s86_s21 = scalar_lea.vmem %s20_s13, 256  ;;  %p91_p4 = scmp.lt.s32.totalorder %s20_s13, %s20_s13 }
   0x9   :  { %p87_p3 = scmp.ne.s32.totalorder %s20_s13, %s86_s21  ;;  %p92_p5 = scmp.lt.s32.totalorder %s86_s21, %s86_s21 }
   0xb   :  { %p93_p6 = por %p92_p5, %p91_p4 }
   0xd   :  { %p94_p7 = pnand %p93_p6, %p87_p3 }
   0xf   :  { %97 = shalt.err (!%p94_p7)
}
  0x10   :  { %s125_s22 = smov 128   ;;  %s126_s23 = smov 8  }
  0x11   :  { %25 = dma.hbm_to_vmem [thread:$0]  %s193_s2, 256, %s20_s13, [#allocation3], %s125_s22, %s125_s22, %s126_s23  }
  0x12   :  { %120 = dma.done.wait [#allocation3], 256  }
  0x13   :  { %121 = vsyncadd [#allocation3], 4294967040  ;;  %v127_v0 = vmov 0   ;;  %v31_v1 = vld [vmem:[%s192_s1] sm:$0xff]  ;;  %v32_v2 = vld [vmem:[%s192_s1 + $0x8] sm:$0xff]  ;;  %s128_s1 = smov [#allocation5]  }
  0x14   :  { %75 = vset.pattern.permute.xlu0 %v127_v0  ;;  %vm33_vm0 = vcmp.ne.f32.partialorder %v31_v1, 0.0  ;;  %vm34_vm1 = vcmp.ne.f32.partialorder %v32_v2, 0.0  ;;  %v35_v5 = vld [vmem:[#allocation2] sm:$0xff]  ;;  %v36_v8 = vld [vmem:[#allocation2 + $0x8] sm:$0xff]  ;;  %s58_s6 = sshll.u32 %s128_s1, 4  ;;  %s59_s6 = int_to_ptr.vmem [resolvable:$true] %s58_s6 }
  0x15   :  { %v39_v3 = vsel %vm33_vm0, 1, %v127_v0  ;;  %v40_v4 = vsel %vm34_vm1, 1, %v127_v0  ;;  %v29_v6 = vld [vmem:[%s191_s0] sm:$0xff]  ;;  %v30_v9 = vld [vmem:[%s191_s0 + $0x8] sm:$0xff]  ;;  %s98_s7 = scalar_lea.vmem %s59_s6, 256  ;;  %p103_p9 = scmp.lt.s32.totalorder %s59_s6, %s59_s6 }
  0x16   :  { %42 = vperm.xlu0 %75, %v39_v3   ;;  %v37_v7 = vadd.f32 %v35_v5, %v29_v6  ;;  %v38_v12 = vadd.f32 %v36_v8, %v30_v9  ;;  %p99_p8 = scmp.ne.s32.totalorder %s59_s6, %s98_s7  ;;  %p104_p10 = scmp.lt.s32.totalorder %s98_s7, %s98_s7 }
  0x18   :  { %p105_p11 = por %p104_p10, %p103_p9 }
  0x1a   :  { %45 = vperm.xlu0 %75, %v40_v4   ;;  %p106_p12 = pnand %p105_p11, %p99_p8 }
  0x95   :  { %v43_v10 = vpop.permute.xlu0 %42 }
  0x96   :  { %vm47_vm2 = vcmp.eq.s32.totalorder %v43_v10, 1 }
  0x97   :  { %v49_v11 = vsel %vm47_vm2, %v37_v7, %v29_v6 }
  0x98   :  { %51 = vst [vmem:[#allocation5] sm:$0xff] %v49_v11 }
  0x99   :  { %v46_v13 = vpop.permute.xlu0 %45 }
  0x9a   :  { %vm48_vm3 = vcmp.eq.s32.totalorder %v46_v13, 1 }
  0x9b   :  { %v50_v14 = vsel %vm48_vm3, %v38_v12, %v30_v9 }
  0x9c   :  { %52 = vst [vmem:[#allocation5 + $0x8] sm:$0xff] %v50_v14 }
  0x9d   :  { %109 = shalt.err (!%p106_p12)
}
  0x9e   :  { %s110_s9 = scalar_lea.hbm %s194_s3, 256 }
  0x9f   :  { %p111_p13 = scmp.ne.s32.totalorder %s194_s3, %s110_s9  ;;  %p114_p0 = scmp.lt.u32.totalorder %s110_s9, %s194_s3 }
  0xa1   :  { %p116_p1 = pnand %p114_p0, %p111_p13 }
  0xa3   :  { %119 = shalt.err (!%p116_p1)
}
  0xa4   :  { %64 = dma.vmem_to_hbm [thread:$0]  %s59_s6, 256, %s194_s3, [#allocation4], %s125_s22, %s125_s22, %s126_s23  }
  0xa5   :  { %122 = dma.done.wait [#allocation4], 256  }
  0xa6   :  { %123 = vsyncadd [#allocation4], 4294967040 }
  0xa7   :  { %68 = vsyncpa [#allocation3], 1 }
  0xa8   :  { %69 = vsyncpa [#allocation4], 1 }

</bundles_post_ra>
